<compile_context>
chip_gen: v7x
topology: tpu7x:2x2x1
jax: 0.10.0
libtpu: 0.0.40
codegen_flags: <defaults>
</compile_context>

<pallas_src>
import math

import jax
import jax.numpy as jnp
import numpy as np
from jax.experimental import pallas as pl
from jax.experimental.pallas import tpu as pltpu


# ----------------------------- Pallas kernel ---------------------------------
def _embed_kernel(x_ref, halo_ref, idx_ref, w_ref, o_ref):
    # x_ref   : (1, TL, C)      current sequence tile of x
    # halo_ref: (1, 1, 2, C)    rows [x[(t0-1) % L], x[(t0+TL) % L]] for this tile
    # idx_ref : (1, TL, 4)      int32 time indices, pre-offset into the combined table
    # w_ref   : (3C + V, D)     [conv tap k=0 ; k=1 ; k=2 ; fixed temporal table]
    # o_ref   : (1, TL, D)
    xt = x_ref[0]                                            # (TL, C)
    TL, C = xt.shape
    hp = halo_ref[0, 0, 0:1, :]                              # (1, C) = x[t0-1] (circular)
    hn = halo_ref[0, 0, 1:2, :]                              # (1, C) = x[t0+TL] (circular)

    # Circular +/-1 row shifts, built entirely in VMEM (x read from HBM exactly once).
    x_prev = jnp.concatenate([hp, xt[:TL - 1, :]], axis=0)   # x[t-1]
    x_next = jnp.concatenate([xt[1:, :], hn], axis=0)        # x[t+1]

    # Multi-hot time features: 4 disjoint index segments -> OR of equality masks.
    idx = idx_ref[0]                                         # (TL, 4)
    V = w_ref.shape[0] - 3 * C
    lane = jax.lax.broadcasted_iota(jnp.int32, (TL, V), 1)
    hot = ((lane == idx[:, 0:1]) | (lane == idx[:, 1:2])
           | (lane == idx[:, 2:3]) | (lane == idx[:, 3:4]))

    # Single fused MXU dot: conv-as-matmul + embedding-gather-as-matmul + final add.
    operand = jnp.concatenate(
        [x_prev, xt, x_next, hot.astype(jnp.float32)], axis=-1)       # (TL, 3C + V)
    o_ref[0] = jnp.dot(operand, w_ref[...],
                       preferred_element_type=jnp.float32).astype(o_ref.dtype)


# ------------------------------ parameters -----------------------------------
def _fixed_table(c_in, d_model):
    """Sinusoidal table exactly as FixedEmbedding.__init__."""
    pos = jnp.arange(c_in, dtype=jnp.float32)[:, None]
    div = jnp.exp(jnp.arange(0, d_model, 2, dtype=jnp.float32)
                  * -(math.log(10000.0) / d_model))
    w = jnp.zeros((c_in, d_model), jnp.float32)
    w = w.at[:, 0::2].set(jnp.sin(pos * div))
    w = w.at[:, 1::2].set(jnp.cos(pos * div))
    return w


def make_params(c_in, d_model, key):
    # Conv1d weight (d_model, c_in, 3), kaiming_normal_ fan_in / leaky_relu (slope 0.01).
    fan_in = c_in * 3
    gain = math.sqrt(2.0 / (1.0 + 0.01 ** 2))
    std = gain / math.sqrt(fan_in)
    conv_w = std * jax.random.normal(key, (d_model, c_in, 3), jnp.float32)

    # conv-as-matmul rows: out[t] = x[t-1] @ W0^T + x[t] @ W1^T + x[t+1] @ W2^T
    w_cat = jnp.concatenate([conv_w[:, :, k].T for k in range(3)], axis=0)   # (3C, D)

    # Fixed temporal tables stacked: [month(13), day(32), weekday(7), hour(24)] = 76 rows.
    table = jnp.concatenate([_fixed_table(13, d_model), _fixed_table(32, d_model),
                             _fixed_table(7, d_model), _fixed_table(24, d_model)], axis=0)
    offsets = jnp.array([0, 13, 13 + 32, 13 + 32 + 7], dtype=jnp.int32)      # mo,day,wd,hr

    # Combined weight so conv + temporal is a single MXU dot in the kernel.
    w_comb = jnp.concatenate([w_cat, table], axis=0)                          # (3C+76, D)
    return w_comb, offsets


# ------------------------------ JAX wrapper ----------------------------------
def _pick_seq_tile(L):
    for cand in (512, 256, 128, 64, 32, 16, 8):
        if L % cand == 0:
            return cand
    return L


def data_embedding_wo_pos(x, x_mark, w_comb, offsets, *, seq_tile=None):
    """x: (B, L, C) float32; x_mark: (B, L, 4) int32 [month, day, weekday, hour]."""
    B, L, C = x.shape
    KV, D = w_comb.shape

    tl = _pick_seq_tile(L) if seq_tile is None else seq_tile
    assert L % tl == 0
    num_lt = L // tl

    # Indices offset into the combined table. Out-of-range x_mark values would silently
    # hit a wrong segment (nn.Embedding would raise); callers must keep them in range.
    idx = x_mark.astype(jnp.int32) + offsets[None, None, :]                   # (B, L, 4)

    # Tiny per-tile halo (2 rows / tile) so the circular conv is exact across tile edges.
    starts = np.arange(num_lt, dtype=np.int64) * tl
    prev_rows = jnp.asarray((starts - 1) % L, dtype=jnp.int32)
    next_rows = jnp.asarray((starts + tl) % L, dtype=jnp.int32)
    halo = jnp.stack([jnp.take(x, prev_rows, axis=1),
                      jnp.take(x, next_rows, axis=1)], axis=2)       # (B, num_lt, 2, C)

    flops = 2 * B * L * KV * D
    bytes_accessed = 4 * (x.size + halo.size + idx.size + w_comb.size + B * L * D)

    out = pl.pallas_call(
        _embed_kernel,
        out_shape=jax.ShapeDtypeStruct((B, L, D), jnp.float32),
        grid_spec=pltpu.PrefetchScalarGridSpec(
            num_scalar_prefetch=0,
            grid=(B, num_lt),
            in_specs=[
                pl.BlockSpec((1, tl, C), lambda b, l: (b, l, 0)),
                pl.BlockSpec((1, 1, 2, C), lambda b, l: (b, l, 0, 0)),
                pl.BlockSpec((1, tl, 4), lambda b, l: (b, l, 0)),
                # Constant index_map: combined weight stays VMEM-resident across steps.
                pl.BlockSpec((KV, D), lambda b, l: (0, 0)),
            ],
            out_specs=pl.BlockSpec((1, tl, D), lambda b, l: (b, l, 0)),
        ),
        compiler_params=pltpu.CompilerParams(
            dimension_semantics=("parallel", "parallel"),
            vmem_limit_bytes=32 * 1024 * 1024,   # safe on v7x's 64 MiB physical VMEM
        ),
        cost_estimate=pl.CostEstimate(flops=flops, transcendentals=0,
                                      bytes_accessed=bytes_accessed),
    )(x, halo, idx, w_comb)
    return out


# ------------------------------ reference ------------------------------------
def _reference(x, x_mark, w_comb, offsets):
    B, L, C = x.shape
    w_cat, table = w_comb[:3 * C], w_comb[3 * C:]
    xc = jnp.concatenate([jnp.roll(x, 1, axis=1), x, jnp.roll(x, -1, axis=1)], axis=-1)
    val = jnp.einsum("blk,kd->bld", xc, w_cat)
    idx = x_mark.astype(jnp.int32) + offsets[None, None, :]
    temporal = jnp.take(table, idx, axis=0).sum(axis=2)
    return val + temporal


# --------------------------------- main ---------------------------------------
if __name__ == "__main__":
    B, L, c_in, d_model = 2, 8, 4, 32

    key = jax.random.PRNGKey(0)
    k_x, k_mark, k_w = jax.random.split(key, 3)

    x = jax.random.normal(k_x, (B, L, c_in), jnp.float32)
    # x_mark columns: [month(0..12), day(0..31), weekday(0..6), hour(0..23)]
    maxes = jnp.array([13, 32, 7, 24], dtype=jnp.int32)
    x_mark = (jax.random.randint(k_mark, (B, L, 4), 0, 1 << 16) % maxes).astype(jnp.int32)

    w_comb, offsets = make_params(c_in, d_model, k_w)

    out = data_embedding_wo_pos(x, x_mark, w_comb, offsets)
    out = jax.block_until_ready(out)

    ref = _reference(x, x_mark, w_comb, offsets)
    np.testing.assert_allclose(np.asarray(out), np.asarray(ref), atol=2e-4, rtol=2e-4)

    print("KERNEL_OK")
</pallas_src>

<mosaic_0001>
module attributes {stable_mosaic.version = 11 : i64} {
  func.func @_embed_kernel(%arg0: i32, %arg1: i32, %arg2: memref<1x8x4xf32, #tpu.memory_space<vmem>>, %arg3: memref<1x1x2x4xf32, #tpu.memory_space<vmem>>, %arg4: memref<1x8x4xi32, #tpu.memory_space<vmem>>, %arg5: memref<88x32xf32, #tpu.memory_space<vmem>>, %arg6: memref<1x8x32xf32, #tpu.memory_space<vmem>>) attributes {dimension_semantics = [#tpu.dimension_semantics<parallel>, #tpu.dimension_semantics<parallel>], iteration_bounds = array<i64: 2, 1>, scalar_prefetch = 0 : i64, scratch_operands = 0 : i64, tpu.core_type = #tpu.core_type<tc>, window_params = [{transform_indices = @transform_0, window_bounds = array<i64: 1, 8, 4>}, {transform_indices = @transform_1, window_bounds = array<i64: 1, 1, 2, 4>}, {transform_indices = @transform_2, window_bounds = array<i64: 1, 8, 4>}, {pipeline_mode = #tpu.pipeline_mode<synchronous>, transform_indices = @transform_3, window_bounds = array<i64: 88, 32>}, {transform_indices = @transform_4, window_bounds = array<i64: 1, 8, 32>}]} {
    %c0 = arith.constant 0 : index
    %c0_0 = arith.constant 0 : index
    %c0_1 = arith.constant 0 : index
    %0 = vector.load %arg2[%c0, %c0_0, %c0_1] : memref<1x8x4xf32, #tpu.memory_space<vmem>>, vector<1x8x4xf32>
    %1 = vector.shape_cast %0 : vector<1x8x4xf32> to vector<8x4xf32>
    %c0_2 = arith.constant 0 : index
    %c0_3 = arith.constant 0 : index
    %c0_4 = arith.constant 0 : index
    %c0_5 = arith.constant 0 : index
    %2 = vector.load %arg3[%c0_2, %c0_3, %c0_4, %c0_5] : memref<1x1x2x4xf32, #tpu.memory_space<vmem>>, vector<1x1x1x4xf32>
    %3 = vector.shape_cast %2 : vector<1x1x1x4xf32> to vector<1x4xf32>
    %c0_6 = arith.constant 0 : index
    %c0_7 = arith.constant 0 : index
    %c1 = arith.constant 1 : index
    %c0_8 = arith.constant 0 : index
    %4 = vector.load %arg3[%c0_6, %c0_7, %c1, %c0_8] : memref<1x1x2x4xf32, #tpu.memory_space<vmem>>, vector<1x1x1x4xf32>
    %5 = vector.shape_cast %4 : vector<1x1x1x4xf32> to vector<1x4xf32>
    %6 = vector.extract_strided_slice %1 {offsets = [0, 0], sizes = [7, 4], strides = [1, 1]} : vector<8x4xf32> to vector<7x4xf32>
    %7 = tpu.concatenate %3, %6 in 0 : vector<1x4xf32>, vector<7x4xf32> -> vector<8x4xf32>
    %8 = vector.extract_strided_slice %1 {offsets = [1, 0], sizes = [7, 4], strides = [1, 1]} : vector<8x4xf32> to vector<7x4xf32>
    %9 = tpu.concatenate %8, %5 in 0 : vector<7x4xf32>, vector<1x4xf32> -> vector<8x4xf32>
    %c0_9 = arith.constant 0 : index
    %c0_10 = arith.constant 0 : index
    %c0_11 = arith.constant 0 : index
    %10 = vector.load %arg4[%c0_9, %c0_10, %c0_11] : memref<1x8x4xi32, #tpu.memory_space<vmem>>, vector<1x8x4xi32>
    %11 = vector.shape_cast %10 : vector<1x8x4xi32> to vector<8x4xi32>
    %12 = tpu.iota {dimensions = array<i32: 1>} : vector<8x76xi32>
    %13 = vector.extract_strided_slice %11 {offsets = [0, 0], sizes = [8, 1], strides = [1, 1]} : vector<8x4xi32> to vector<8x1xi32>
    %14 = vector.broadcast %13 : vector<8x1xi32> to vector<8x76xi32>
    %15 = arith.cmpi eq, %12, %14 : vector<8x76xi32>
    %16 = vector.extract_strided_slice %11 {offsets = [0, 1], sizes = [8, 1], strides = [1, 1]} : vector<8x4xi32> to vector<8x1xi32>
    %17 = vector.broadcast %16 : vector<8x1xi32> to vector<8x76xi32>
    %18 = arith.cmpi eq, %12, %17 : vector<8x76xi32>
    %19 = arith.ori %15, %18 : vector<8x76xi1>
    %20 = vector.extract_strided_slice %11 {offsets = [0, 2], sizes = [8, 1], strides = [1, 1]} : vector<8x4xi32> to vector<8x1xi32>
    %21 = vector.broadcast %20 : vector<8x1xi32> to vector<8x76xi32>
    %22 = arith.cmpi eq, %12, %21 : vector<8x76xi32>
    %23 = arith.ori %19, %22 : vector<8x76xi1>
    %24 = vector.extract_strided_slice %11 {offsets = [0, 3], sizes = [8, 1], strides = [1, 1]} : vector<8x4xi32> to vector<8x1xi32>
    %25 = vector.broadcast %24 : vector<8x1xi32> to vector<8x76xi32>
    %26 = arith.cmpi eq, %12, %25 : vector<8x76xi32>
    %27 = arith.ori %23, %26 : vector<8x76xi1>
    %28 = arith.extui %27 : vector<8x76xi1> to vector<8x76xi32>
    %29 = arith.sitofp %28 : vector<8x76xi32> to vector<8x76xf32>
    %30 = tpu.concatenate %7, %1, %9, %29 in 1 : vector<8x4xf32>, vector<8x4xf32>, vector<8x4xf32>, vector<8x76xf32> -> vector<8x88xf32>
    %c0_12 = arith.constant 0 : index
    %c0_13 = arith.constant 0 : index
    %31 = vector.load %arg5[%c0_12, %c0_13] : memref<88x32xf32, #tpu.memory_space<vmem>>, vector<88x32xf32>
    %cst = arith.constant dense<0.000000e+00> : vector<8x32xf32>
    %32 = tpu.matmul %30, %31, %cst {dimension_numbers = #tpu.dot_dimension_numbers<[1], [0], [0], [1], [0, 0, 1, 1], [], []>} : vector<8x88xf32>, vector<88x32xf32>, vector<8x32xf32> -> vector<8x32xf32>
    %c0_14 = arith.constant 0 : index
    %c0_15 = arith.constant 0 : index
    %c0_16 = arith.constant 0 : index
    %33 = vector.load %arg6[%c0_14, %c0_15, %c0_16] : memref<1x8x32xf32, #tpu.memory_space<vmem>>, vector<1x8x32xf32>
    %34 = vector.shape_cast %33 : vector<1x8x32xf32> to vector<8x32xf32>
    %35 = vector.shape_cast %32 : vector<8x32xf32> to vector<1x8x32xf32>
    tpu.vector_store %arg6[%c0_14, %c0_15, %c0_16], %35 {strides = array<i32>} : memref<1x8x32xf32, #tpu.memory_space<vmem>>, vector<1x8x32xf32>,
    return
  }
  func.func @transform_0(%arg0: i32, %arg1: i32) -> (i32, i32, i32) {
    %c0_i32 = arith.constant 0 : i32
    %c0_i32_0 = arith.constant 0 : i32
    return %arg0, %arg1, %c0_i32 : i32, i32, i32
  }
  func.func @transform_1(%arg0: i32, %arg1: i32) -> (i32, i32, i32, i32) {
    %c0_i32 = arith.constant 0 : i32
    %c0_i32_0 = arith.constant 0 : i32
    %c0_i32_1 = arith.constant 0 : i32
    return %arg0, %arg1, %c0_i32, %c0_i32_0 : i32, i32, i32, i32
  }
  func.func @transform_2(%arg0: i32, %arg1: i32) -> (i32, i32, i32) {
    %c0_i32 = arith.constant 0 : i32
    %c0_i32_0 = arith.constant 0 : i32
    return %arg0, %arg1, %c0_i32 : i32, i32, i32
  }
  func.func @transform_3(%arg0: i32, %arg1: i32) -> (i32, i32) {
    %c0_i32 = arith.constant 0 : i32
    %c0_i32_0 = arith.constant 0 : i32
    %c0_i32_1 = arith.constant 0 : i32
    return %c0_i32, %c0_i32_0 : i32, i32
  }
  func.func @transform_4(%arg0: i32, %arg1: i32) -> (i32, i32, i32) {
    %c0_i32 = arith.constant 0 : i32
    %c0_i32_0 = arith.constant 0 : i32
    return %arg0, %arg1, %c0_i32 : i32, i32, i32
  }
}

</mosaic_0001>

<bundles_post_ra>
// kernel: tpu_custom_call.1
= control target key start
LH: loop header
LB: loop body
LE: loop exit
PB: predicated region body
PF: predicated region fallthrough
CT: control target
= control target key end

     0   :  { %9 = vsyncpa [#allocation3], 0  ;;  %s937_s0 = inlined_call_operand.vmem [shape: f32[2,8,4], index: 0, kind: input, shape index: {}]   ;;  %s938_s1 = inlined_call_operand.vmem [shape: f32[2,1,2,4], index: 1, kind: input, shape index: {}]   ;;  %s939_s2 = inlined_call_operand.vmem [shape: s32[2,8,4], index: 2, kind: input, shape index: {}]   ;;  %s940_s3 = inlined_call_operand.vmem [shape: f32[88,32], index: 3, kind: input, shape index: {}]   ;;  %s941_s4 = inlined_call_operand.hbm [shape: f32[2,8,32], index: 4, kind: output, shape index: {}]  }
   0x1   :  { %11 = vsyncpa [#allocation3 + $0x1], 0  ;;  %s786_s15 = smov 0   ;;  %s788_s16 = smov 0  }
   0x2   :  { %s790_s17 = smov 0   ;;  %s792_s18 = smov 0  }
   0x3   :  { %s794_s19 = smov 0   ;;  %s796_s20 = smov 0  }
   0x4 LB: > { %s533_s21 = sadd.s32 4294967295, %s748_s20   ;;  %s534_s22 = sadd.s32 4294967294, %s748_s20   ;;  %s748_s20 = sphi %s796_s20, %s17_s20   ;;  %s744_s19 = sphi %s794_s19, %s948_s19   ;;  %s740_s18 = sphi %s792_s18, %s947_s18   ;;  %s736_s17 = sphi %s790_s17, %s946_s17   ;;  %s732_s16 = sphi %s788_s16, %s945_s16   ;;  %s728_s15 = sphi %s786_s15, %s944_s15  }
   0x5   : > { %s29_s23 = sadd.s32 1, %s744_s19  ;;  %s143_s24 = sadd.s32 1, %s736_s17 }
   0x6   : > { %p31_p0 = scmp.ge.s32.totalorder %s29_s23, 2  ;;  %p153_p1 = scmp.ne.s32.totalorder %s736_s17, %s732_s16 }
   0x7   : > { %p154_p2 = scmp.eq.s32.totalorder %s533_s21, 1  ;;  %p159_p3 = scmp.ne.s32.totalorder %s732_s16, %s728_s15 }
   0x8   : > { %s950_s23 = smov (%p31_p0, %s29_s23), 0  ;;  %p160_p5 = scmp.eq.s32.totalorder %s534_s22, 1 }
   0x9   : > { %p826_p4 = por %p154_p2, %p153_p1  ;;  %s138_s26 = ssub.s32 %s744_s19, %s950_s23 }
   0xa   : > { %p537_p6 = scmp.ge.s32.totalorder %s748_s20, 1  ;;  %p141_p7 = scmp.eq.s32.totalorder %s138_s26, 0 }
   0xb   : > { %p833_p8 = por %p160_p5, %p159_p3  ;;  %p211_p9 = scmp.lt.s32.totalorder %s748_s20, 3 }
   0xc   : > { %s839_s28 = scalar_select %p141_p7, %s736_s17, %s143_s24  }
   0xd   : > { %p212_p10 = pnand %p537_p6, %p211_p9 }
   0xe   : > { %p253_p11 = scmp.lt.s32.totalorder (!%p212_p10), %s740_s18, 1  ;;  %v750_v0 = vmov (!%p212_p10), 0   ;;  %v751_v1 = vmov (!%p212_p10), 2   ;;  %v752_v5 = vmov (!%p212_p10), 1   ;;  %v753_v6 = vmov (!%p212_p10), 3   ;;  %s754_s21 = smov (!%p212_p10), 4  }
   0xf   : > { %215 = sbr.rel (%p212_p10) target bundleno = 507 (0x1fb), region = 36  ;;  %665 = vset.pattern.permute.xlu0 (!%p212_p10), %v750_v0  ;;  %667 = vset.pattern.permute.xlu1 (!%p212_p10), %v751_v1  ;;  %vm287_vm0 = vcmask (!%p212_p10), 1046528   ;;  %s755_s22 = smov (!%p212_p10), 8   ;;  %v330_v11 = vld [vmem:[%s940_s3] sm:$0xff] (!%p212_p10)  ;;  %v331_v12 = vld [vmem:[%s940_s3 + $0x8] sm:$0xff] (!%p212_p10)  ;;  %v332_v13 = vld [vmem:[%s940_s3 + $0x10] sm:$0xff] (!%p212_p10)  ;;  %v290_v31 = vlaneseq (!%p212_p10) }
  0x10   : > { %vm280_vm1 = vcmask (!%p212_p10), 1040384   ;;  %v756_v14 = vmov (!%p212_p10), 0.0|0.0   ;;  %v586_v15 = vpack.c.bf16 (!%p212_p10), %v331_v12, %v330_v11  ;;  %v333_v16 = vld [vmem:[%s940_s3 + $0x18] sm:$0xff] (!%p212_p10)  ;;  %v334_v20 = vld [vmem:[%s940_s3 + $0x20] sm:$0xff] (!%p212_p10)  ;;  %v335_v21 = vld [vmem:[%s940_s3 + $0x28] sm:$0xff] (!%p212_p10)  ;;  %v757_v29 = vmov (!%p212_p10), 0.0  }
  0x11   : > { %585 = vmatprep.subr.bf16.mxu0 (!%p212_p10), %v756_v14  ;;  %v589_v18 = vpack.c.bf16 (!%p212_p10), %v333_v16, %v332_v13  ;;  %v592_v22 = vpack.c.bf16 (!%p212_p10), %v335_v21, %v334_v20  ;;  %v336_v23 = vld [vmem:[%s940_s3 + $0x30] sm:$0xff] (!%p212_p10)  ;;  %v337_v24 = vld [vmem:[%s940_s3 + $0x38] sm:$0xff] (!%p212_p10)  ;;  %v338_v26 = vld [vmem:[%s940_s3 + $0x40] sm:$0xff] (!%p212_p10)  ;;  %vm758_vm2 = vmmov (!%p212_p10), 0   ;;  %v291_v34 = vand.u32 (!%p212_p10), 127, %v290_v31  ;;  %s545_s10 = sshll.u32 (!%p212_p10), %s740_s18, 7 }
  0x12   : > { %587 = vmatpush3.bf16.msra.mxu0 (!%p212_p10), %v586_v15  ;;  %v595_v25 = vpack.c.bf16 (!%p212_p10), %v337_v24, %v336_v23  ;;  %v339_v27 = vld [vmem:[%s940_s3 + $0x48] sm:$0xff] (!%p212_p10)  ;;  %v340_v30 = vld [vmem:[%s940_s3 + $0x50] sm:$0xff] (!%p212_p10)  ;;  %582 = vmatprep.mubr.msk.f32.mxu0 (!%p212_p10), %vm758_vm2, %v757_v29  ;;  %vm324_vm10 = vcmask (!%p212_p10), 31744   ;;  %vm326_vm11 = vcmask (!%p212_p10), 64512   ;;  %vm328_vm12 = vcmask (!%p212_p10), 97280  }
  0x13   : > { %588 = vmatprep.subr.bf16.mxu0 (!%p212_p10), %v756_v14  ;;  %v598_v28 = vpack.c.bf16 (!%p212_p10), %v339_v27, %v338_v26  ;;  %vm341_vm13 = vcmask (!%p212_p10), 719872   ;;  %vm415_vm14 = vcmask (!%p212_p10), 261120  }
  0x16   : > { %s254_s29 = scalar_select %p253_p11, %s740_s18, 1  ;;  %590 = vmatpush3.bf16.msra.mxu0 %v589_v18 }
  0x17   : > { %591 = vmatprep.subr.bf16.mxu0 %v756_v14  ;;  %s760_s18 = smov [#allocation2]  }
  0x18   : > { %s539_s30 = sshll.u32 %s254_s29, 3  ;;  %s540_s8 = sshll.u32 %s254_s29, 1 }
  0x19   : > { %s273_s7 = scalar_lea.vmem %s939_s2, %s539_s30  ;;  %s259_s11 = scalar_lea.vmem %s937_s0, %s539_s30 }
  0x1a   : > { %v289_v2 = vld [vmem:[%s273_s7] sm:$0xff]  ;;  %s266_s14 = scalar_lea.vmem %s938_s1, %s540_s8  ;;  %593 = vmatpush3.bf16.msra.mxu0 %v592_v22  ;;  %s759_s7 = smov 12  }
  0x1b   : > { %293 = vperm.xlu0 %665, %v289_v2   ;;  %302 = vperm.xlu1 %667, %v289_v2   ;;  %v274_v3 = vld [vmem:[%s259_s11] sm:$0xff]  ;;  %s250_s8 = sand.u32 1, %s732_s16   ;;  %s674_s26 = sshll.u32 %s760_s18, 4  ;;  %s675_s26 = int_to_ptr.vmem [resolvable:$false] %s674_s26 }
  0x1c   : > { %v276_v4 = vld [vmem:[%s266_s14 + $0x1] sm:$0x1]  ;;  %v282_v7 = vrot.slane %v274_v3, 1  ;;  %v278_v10 = vrot.slane %v274_v3, 7  ;;  %v275_v17 = vld [vmem:[%s266_s14] sm:$0x1]  ;;  %594 = vmatprep.subr.bf16.mxu0 %v756_v14  ;;  %s890_s14 = scalar_lea.hbm %s941_s4, %s545_s10 }
  0x1d   : > { %v285_v8 = vrot.slane %v276_v4, 1  ;;  %s538_s9 = sshll.u32 %s250_s8, 3  ;;  %s676_s29 = scalar_lea.vmem %s675_s26, 256 }
  0x1e   : > { %v281_v19 = vsel %vm280_vm1, %v275_v17, %v278_v10  ;;  %596 = vmatpush3.bf16.msra.mxu0 %v595_v25  ;;  %s252_s11 = scalar_lea.vmem [#allocation2], %s538_s9 }
  0x1f   : > { %666 = vset.pattern.permute.xlu0 %v752_v5  ;;  %668 = vset.pattern.permute.xlu1 %v753_v6  ;;  %v288_v9 = vsel %vm287_vm0, %v282_v7, %v285_v8  ;;  %s432_s12 = sshll.u32 %s252_s11, 4  ;;  %s892_s12 = int_to_ptr.vmem [resolvable:$true] %s432_s12 }
  0x20   : > { %297 = vperm.xlu0 %666, %v289_v2   ;;  %307 = vperm.xlu1 %668, %v289_v2   ;;  %s670_s24 = scalar_lea.vmem %s892_s12, 128  ;;  %p677_p1 = scmp.lt.s32.totalorder %s892_s12, %s675_s26 }
  0x21   : > { %597 = vmatprep.subr.bf16.mxu0 %v756_v14  ;;  %p671_p12 = scmp.ne.s32.totalorder %s892_s12, %s670_s24  ;;  %p678_p2 = scmp.lt.s32.totalorder %s676_s29, %s670_s24 }
  0x22   : > { %599 = vmatpush3.bf16.msra.mxu0 %v598_v28 }
  0x23   : > { %580 = vmatprep.subr.mxu0 %v757_v29  ;;  %p672_p13 = pnand %p671_p12, %p826_p4  ;;  %p679_p3 = por %p678_p2, %p677_p1 }
  0x24   : > { %313 = vrot.lane.b32.xlu1 %v274_v3, %s754_s21  ;;  %317 = vrot.lane.b32.xlu0 %v288_v9, %s755_s22  ;;  %s418_s22 = scalar_lea.sflag [#allocation3], %s250_s8 }
  0x25   : > { %669 = vset.pattern.permute.xlu0 %v753_v6  ;;  %p673_p0 = pneg %p672_p13 }
  0x26   : > { %581 = vmatpush3.msra.mxu0 %v340_v30 }
  0x27   : > { %p680_p5 = pnand %p679_p3, %p673_p0 }
  0x9a   : > { %v294_v32 = vpop.permute.xlu0 %293  ;;  %v303_v33 = vpop.permute.xlu1 %302 }
  0x9b   : > { %vm295_vm3 = vcmp.eq.s32.totalorder %v291_v34, %v294_v32  ;;  %vm304_vm6 = vcmp.eq.s32.totalorder %v291_v34, %v303_v33 }
  0x9f   : > { %v298_v35 = vpop.permute.xlu0 %297  ;;  %v308_v36 = vpop.permute.xlu1 %307 }
  0xa0   : > { %vm299_vm4 = vcmp.eq.s32.totalorder %v291_v34, %v298_v35  ;;  %vm309_vm5 = vcmp.eq.s32.totalorder %v291_v34, %v308_v36 }
  0xa1   : > { %vm300_vm7 = vmor %vm295_vm3, %vm299_vm4 }
  0xa2   : > { %vm305_vm8 = vmor %vm300_vm7, %vm304_vm6 }
  0xa3   : > { %vm310_vm9 = vmor %vm305_vm8, %vm309_vm5  ;;  %v314_v38 = vpop.permute.xlu1 %313  ;;  %v318_v40 = vpop.permute.xlu0 %317 }
  0xa4   : > { %v542_v37 = vsel %vm310_vm9, 1.0, %v757_v29  ;;  %v325_v39 = vsel %vm324_vm10, %v281_v19, %v314_v38 }
  0xa5   : > { %321 = vrot.lane.b32.xlu1 %v542_v37, %s759_s7  ;;  %v327_v41 = vsel %vm326_vm11, %v325_v39, %v318_v40 }
 0x117   : > { %v322_v42 = vpop.permute.xlu1 %321 }
 0x118   : > { %v329_v43 = vsel %vm328_vm12, %v327_v41, %v322_v42 }
 0x119   : > { %583 = vmatmul.mubr.msk.f32.vlgmr.msra.gmra.mrb[0].mxu0 %vm341_vm13, %v329_v43 }
 0x1ec   : > { %v411_v44 = vpop.f32.mrb[0].mxu0 }
 0x1ed   : > { %416 = vst.msk [vmem:[%s252_s11] sm:$0xff] %vm415_vm14, %v411_v44  ;;  %v584_v45 = vpop.f32.mrb[1].mxu0 }
 0x1ee   : > { %683 = shalt.err (!%p680_p5)
}
 0x1ef   : > { %s684_s30 = scalar_lea.hbm %s890_s14, 128  ;;  %s688_s7 = scalar_lea.hbm %s941_s4, 256 }
 0x1f0   : > { %p685_p6 = scmp.ne.s32.totalorder %s890_s14, %s684_s30  ;;  %p689_p10 = scmp.lt.u32.totalorder %s890_s14, %s941_s4 }
 0x1f1   : > { %p690_p11 = scmp.lt.u32.totalorder %s688_s7, %s684_s30  ;;  %p692_p13 = scmp.lt.u32.totalorder %s684_s30, %s890_s14 }
 0x1f2   : > { %p686_p7 = pnand %p685_p6, %p826_p4 }
 0x1f3   : > { %p691_p12 = por %p690_p11, %p689_p10 }
 0x1f4   : > { %p687_p9 = pneg %p686_p7 }
 0x1f5   : > { %p693_p0 = por %p692_p13, %p691_p12 }
 0x1f7   : > { %p694_p1 = pnand %p693_p0, %p687_p9 }
 0x1f9   : > { %697 = shalt.err (!%p694_p1)
}
 0x1fa   : > { %600 = dma.vmem_to_hbm [thread:$0]  (%p826_p4), %s892_s12, 128, %s890_s14, %s418_s22  }
 0x1fb PF: > { %p606_p2 = scmp.ge.s32.totalorder %s748_s20, 2  ;;  %s444_s10 = sand.u32 1, %s728_s15  }
 0x1fc   : > { %s445_s11 = scalar_lea.sflag [#allocation3], %s444_s10 }
 0x1fd   : > { %p603_p3 = pnand %p606_p2, %p833_p8 }
 0x1ff   : > { %723 = dma.done.wait (!%p603_p3), %s445_s11, 128  }
 0x200   : > { %725 = vsyncadd (!%p603_p3), %s445_s11, 4294967168  ;;  %s17_s20 = sadd.s32 1, %s748_s20   ;;  %s944_s15 = smov %s732_s16 }
 0x201   : > { %p14_p5 = scmp.ge.s32.totalorder %s17_s20, 4   ;;  %s945_s16 = smov %s736_s17 }
 0x202   : > { %s946_s17 = smov %s839_s28  ;;  %s947_s18 = smov %s744_s19 }
 0x203   : > { %s948_s19 = smov %s950_s23  ;;  %16 = sbr.rel (!%p14_p5) target bundleno = 4 (0x4), region = 77 }
 0x20a   :  { %450 = vsyncpa [#allocation3], 1 }
 0x20b   :  { %452 = vsyncpa [#allocation3 + $0x1], 1 }

</bundles_post_ra>
